<compile_context>
chip_gen: v6e
topology: v6e:2x2x1
jax: 0.10.0
libtpu: 0.0.40
codegen_flags: <defaults>
</compile_context>

<pallas_src>
import jax
import jax.numpy as jnp
from jax import lax
from jax.experimental import pallas as pl
from jax.experimental.pallas import tpu as pltpu

VMEM = pl.BlockSpec(memory_space=pltpu.MemorySpace.VMEM)
SMEM = pl.BlockSpec(memory_space=pltpu.MemorySpace.SMEM)


# ---------------------------------------------------------------------------
# Kernel 1: fused var/cons embeddings (one call, two matmuls, two outputs)
# ---------------------------------------------------------------------------

def _embed_kernel(x_ref, y_ref, wx_ref, bx_ref, wy_ref, by_ref, xo_ref, yo_ref):
    xo_ref[...] = jnp.maximum(
        jnp.dot(x_ref[...], wx_ref[...], preferred_element_type=jnp.float32)
        + bx_ref[...], 0.0)
    yo_ref[...] = jnp.maximum(
        jnp.dot(y_ref[...], wy_ref[...], preferred_element_type=jnp.float32)
        + by_ref[...], 0.0)


def embed(x, y, wx, bx, wy, by):
    nv, nc, f = x.shape[0], y.shape[0], wx.shape[1]
    return pl.pallas_call(
        _embed_kernel,
        out_shape=(jax.ShapeDtypeStruct((nv, f), jnp.float32),
                   jax.ShapeDtypeStruct((nc, f), jnp.float32)),
        in_specs=[VMEM] * 6,
        out_specs=(VMEM, VMEM),
    )(x, y, wx, bx, wy, by)


# ---------------------------------------------------------------------------
# Kernel 2: all PDHG layers fused; grid=(num_layers,), weights streamed per layer
# ---------------------------------------------------------------------------

def _pdhg_layers_kernel(scal_ref, x0_ref, y0_ref, a_ref, c_ref, b_ref,
                        ukx_w_ref, ukx_b_ref, uky_w_ref, uky_b_ref,
                        vky_w_ref, vky_b_ref, comb_w_ref, comb_b_ref,
                        x_out_ref, y_out_ref, x_st, y_st):
    l = pl.program_id(0)

    # Initialize the carried state from the embeddings at the first layer.
    @pl.when(l == 0)
    def _():
        x_st[...] = x0_ref[...]
        y_st[...] = y0_ref[...]

    tau = scal_ref[l, 0]
    sigma = scal_ref[l, 1]
    a = a_ref[...]                      # bf16 (n_cons, n_vars), VMEM-resident
    x = x_st[...]
    y = y_st[...]

    # ---- x-update:  x <- relu( Ukx(x) - tau * (c - A^T @ Uky(y)) ) ----------
    ukx = jnp.dot(x, ukx_w_ref[0], preferred_element_type=jnp.float32) + ukx_b_ref[0]
    uky = jnp.dot(y, uky_w_ref[0], preferred_element_type=jnp.float32) + uky_b_ref[0]
    # A^T @ Uky(y) without materializing AT: contract A's row (n_cons) dim.
    at_uky = lax.dot_general(a, uky.astype(a.dtype),
                             dimension_numbers=(((0,), (0,)), ((), ())),
                             preferred_element_type=jnp.float32)
    # c is (n_vars, 1); broadcasting replaces `c @ ones(1, f)`.
    x_new = jnp.maximum(ukx - tau * (c_ref[...] - at_uky), 0.0)
    x_st[...] = x_new

    # ---- y-update: y <- relu( Vky(y) - sigma * (b - A @ (2*Wkx - Vkx)(x)) ) --
    # 2*A@Wkx(x) - A@Vkx(x) folded into one matmul via pre-combined weights.
    vky = jnp.dot(y, vky_w_ref[0], preferred_element_type=jnp.float32) + vky_b_ref[0]
    comb = jnp.dot(x_new, comb_w_ref[0], preferred_element_type=jnp.float32) + comb_b_ref[0]
    a_comb = jnp.dot(a, comb.astype(a.dtype), preferred_element_type=jnp.float32)
    y_new = jnp.maximum(vky - sigma * (b_ref[...] - a_comb), 0.0)
    y_st[...] = y_new

    # Output blocks have a constant index_map -> written back to HBM once at end.
    x_out_ref[...] = x_new
    y_out_ref[...] = y_new


def pdhg_layers(scal, x0, y0, a_bf16, c, b,
                ukx_w, ukx_b, uky_w, uky_b, vky_w, vky_b, comb_w, comb_b):
    num_layers, f, _ = ukx_w.shape
    nv, nc = x0.shape[0], y0.shape[0]

    def const(shape):  # full-array block, constant index -> fetched once, resident
        return pl.BlockSpec(shape, lambda l, _s=shape: (0,) * len(_s))

    per_layer_w = pl.BlockSpec((1, f, f), lambda l: (l, 0, 0))
    per_layer_b = pl.BlockSpec((1, 1, f), lambda l: (l, 0, 0))

    return pl.pallas_call(
        _pdhg_layers_kernel,
        out_shape=(jax.ShapeDtypeStruct((nv, f), jnp.float32),
                   jax.ShapeDtypeStruct((nc, f), jnp.float32)),
        grid_spec=pltpu.PrefetchScalarGridSpec(
            num_scalar_prefetch=0,
            grid=(num_layers,),
            in_specs=[
                SMEM,                    # (L, 2) tau/sigma table
                const((nv, f)),          # embedded x
                const((nc, f)),          # embedded y
                const((nc, nv)),         # A (bf16), resident for all layers
                const((nv, 1)),          # c
                const((nc, 1)),          # b
                per_layer_w, per_layer_b,   # Ukx
                per_layer_w, per_layer_b,   # Uky
                per_layer_w, per_layer_b,   # Vky
                per_layer_w, per_layer_b,   # combined 2*Wkx - Vkx
            ],
            out_specs=(const((nv, f)), const((nc, f))),
            scratch_shapes=[pltpu.VMEM((nv, f), jnp.float32),   # carried x
                            pltpu.VMEM((nc, f), jnp.float32)],  # carried y
        ),
        compiler_params=pltpu.CompilerParams(
            dimension_semantics=("arbitrary",),   # sequential recurrence over layers
            vmem_limit_bytes=48 * 1024 * 1024,    # explicit, safe on v5e/v6e/v7x
        ),
    )(scal, x0, y0, a_bf16, c, b,
      ukx_w, ukx_b, uky_w, uky_b, vky_w, vky_b, comb_w, comb_b)


# ---------------------------------------------------------------------------
# Kernel 3: output head — output_module1 applied to both x and y in one call
# ---------------------------------------------------------------------------

def _head_kernel(x_ref, y_ref, w1_ref, b1_ref, w2_ref, xo_ref, yo_ref):
    hx = jnp.maximum(
        jnp.dot(x_ref[...], w1_ref[...], preferred_element_type=jnp.float32)
        + b1_ref[...], 0.0)
    hy = jnp.maximum(
        jnp.dot(y_ref[...], w1_ref[...], preferred_element_type=jnp.float32)
        + b1_ref[...], 0.0)
    xo_ref[...] = jnp.dot(hx, w2_ref[...], preferred_element_type=jnp.float32)
    yo_ref[...] = jnp.dot(hy, w2_ref[...], preferred_element_type=jnp.float32)


def head(x, y, w1, b1, w2):
    nv, nc = x.shape[0], y.shape[0]
    return pl.pallas_call(
        _head_kernel,
        out_shape=(jax.ShapeDtypeStruct((nv, 1), jnp.float32),
                   jax.ShapeDtypeStruct((nc, 1), jnp.float32)),
        in_specs=[VMEM] * 5,
        out_specs=(VMEM, VMEM),
    )(x, y, w1, b1, w2)


# ---------------------------------------------------------------------------
# Parameter init (deterministic, synthetic) and forward glue
# ---------------------------------------------------------------------------

def _init_linear(key, in_f, out_f, bias=True):
    kw, kb = jax.random.split(key)
    bound = 1.0 / jnp.sqrt(in_f)
    w = jax.random.uniform(kw, (in_f, out_f), jnp.float32, -bound, bound)  # (in, out)
    if bias:
        b = jax.random.uniform(kb, (1, out_f), jnp.float32, -bound, bound)
        return w, b
    return (w,)


def init_pdhg_net(key, x_size, y_size, feat_sizes):
    # The reference forward feeds the *updated* x into pdhg_layer_y, which only
    # type-checks when all feature sizes are equal (same quirk as the torch code).
    assert all(f == feat_sizes[0] for f in feat_sizes)
    keys = iter(jax.random.split(key, 64))
    params = {
        "var_emb": _init_linear(next(keys), x_size, feat_sizes[0]),
        "cons_emb": _init_linear(next(keys), y_size, feat_sizes[0]),
        "layers": [],
    }
    for i in range(len(feat_sizes) - 1):
        fi, fo = feat_sizes[i], feat_sizes[i + 1]
        ukx_w, ukx_b = _init_linear(next(keys), fi, fo)
        uky_w, uky_b = _init_linear(next(keys), fi, fo)
        vky_w, vky_b = _init_linear(next(keys), fi, fo)
        wkx_w, wkx_b = _init_linear(next(keys), fi, fo)
        vkx_w, vkx_b = _init_linear(next(keys), fi, fo)
        tau = jax.random.normal(next(keys), (1, 1), jnp.float32)
        sigma = jax.random.normal(next(keys), (1, 1), jnp.float32)
        params["layers"].append(dict(
            ukx_w=ukx_w, ukx_b=ukx_b, uky_w=uky_w, uky_b=uky_b, tau=tau,
            vky_w=vky_w, vky_b=vky_b, wkx_w=wkx_w, wkx_b=wkx_b,
            vkx_w=vkx_w, vkx_b=vkx_b, sigma=sigma))
    f = feat_sizes[-1]
    w1, b1 = _init_linear(next(keys), f, f)
    (w2,) = _init_linear(next(keys), f, 1, bias=False)
    params["out1"] = (w1, b1, w2)
    # output_module2 exists in the torch module but is unused by its forward.
    w1b, b1b = _init_linear(next(keys), f, f)
    (w2b,) = _init_linear(next(keys), f, 1, bias=False)
    params["out2"] = (w1b, b1b, w2b)
    return params


def _stack_layer_params(layers):
    """Stack per-layer weights with a leading layer axis and pre-combine
    2*Wkx - Vkx (and biases) so the kernel does a single A-side matmul."""
    stack = lambda k: jnp.stack([lp[k] for lp in layers])
    taus = jnp.stack([lp["tau"].reshape(()) for lp in layers])
    sigmas = jnp.stack([lp["sigma"].reshape(()) for lp in layers])
    return dict(
        scal=jnp.stack([taus, sigmas], axis=1),                  # (L, 2)
        ukx_w=stack("ukx_w"), ukx_b=stack("ukx_b"),
        uky_w=stack("uky_w"), uky_b=stack("uky_b"),
        vky_w=stack("vky_w"), vky_b=stack("vky_b"),
        comb_w=2.0 * stack("wkx_w") - stack("vkx_w"),
        comb_b=2.0 * stack("wkx_b") - stack("vkx_b"),
    )


def pdhg_net_forward(params, x, y, A, AT, c, b):
    del AT  # not needed: A^T is applied via a transposed contraction on A
    x_emb, y_emb = embed(x, y, *params["var_emb"], *params["cons_emb"])
    if len(params["layers"]) == 0:
        x_f, y_f = x_emb, y_emb
    else:
        sp = _stack_layer_params(params["layers"])
        a16 = A.astype(jnp.bfloat16)     # bf16 MXU inputs, f32 accumulation
        x_f, y_f = pdhg_layers(sp["scal"], x_emb, y_emb, a16, c, b,
                               sp["ukx_w"], sp["ukx_b"], sp["uky_w"], sp["uky_b"],
                               sp["vky_w"], sp["vky_b"], sp["comb_w"], sp["comb_b"])
    return head(x_f, y_f, *params["out1"])   # output_module1 used twice (spec quirk)


# ---------------------------------------------------------------------------
# Pure-JAX references for verification
# ---------------------------------------------------------------------------

def pdhg_net_reference(params, x, y, A, AT, c, b, mirror_kernel_precision=False):
    """mirror_kernel_precision=False : faithful fp32 PyTorch math.
    mirror_kernel_precision=True  : same algebra/precision as the Pallas kernel
    (pre-combined Wkx/Vkx weights, bf16 A-matmul operands, f32 accumulation)."""
    relu = lambda t: jnp.maximum(t, 0.0)

    def mm_bf16(m, v):
        return jnp.dot(m.astype(jnp.bfloat16), v.astype(jnp.bfloat16),
                       preferred_element_type=jnp.float32)

    wx, bx = params["var_emb"]
    wy, by = params["cons_emb"]
    x = relu(x @ wx + bx)
    y = relu(y @ wy + by)
    for lp in params["layers"]:
        tau = lp["tau"][0, 0]
        sigma = lp["sigma"][0, 0]
        ukx = x @ lp["ukx_w"] + lp["ukx_b"]
        uky = y @ lp["uky_w"] + lp["uky_b"]
        at_uky = mm_bf16(AT, uky) if mirror_kernel_precision else AT @ uky
        x = relu(ukx - tau * (c - at_uky))
        vky = y @ lp["vky_w"] + lp["vky_b"]
        if mirror_kernel_precision:
            comb = (x @ (2.0 * lp["wkx_w"] - lp["vkx_w"])
                    + (2.0 * lp["wkx_b"] - lp["vkx_b"]))
            rhs = b - mm_bf16(A, comb)
        else:
            wkx = x @ lp["wkx_w"] + lp["wkx_b"]
            vkx = x @ lp["vkx_w"] + lp["vkx_b"]
            rhs = b - 2.0 * (A @ wkx) + A @ vkx
        y = relu(vky - sigma * rhs)
    w1, b1, w2 = params["out1"]
    return relu(x @ w1 + b1) @ w2, relu(y @ w1 + b1) @ w2


if __name__ == "__main__":
    key = jax.random.PRNGKey(0)
    k_x, k_y, k_m, k_v, k_c, k_b, k_p = jax.random.split(key, 7)

    n_vars, n_cons = 64, 32
    x_size, y_size = 8, 4
    feat_sizes = (128, 128, 128)   # lane-dense feature width (multiple of 128)

    x = jax.random.normal(k_x, (n_vars, x_size), jnp.float32)
    y = jax.random.normal(k_y, (n_cons, y_size), jnp.float32)
    mask = (jax.random.uniform(k_m, (n_cons, n_vars)) < 0.3).astype(jnp.float32)
    A = 0.3 * mask * jax.random.normal(k_v, (n_cons, n_vars), jnp.float32)  # sparse-ish, dense storage
    AT = A.T
    c = jax.random.normal(k_c, (n_vars, 1), jnp.float32)
    b = jax.random.normal(k_b, (n_cons, 1), jnp.float32)

    params = init_pdhg_net(k_p, x_size, y_size, feat_sizes)

    x_out, y_out = pdhg_net_forward(params, x, y, A, AT, c, b)
    jax.block_until_ready((x_out, y_out))
    assert x_out.shape == (n_vars, 1) and y_out.shape == (n_cons, 1)

    # 1) Structure check against a pure-JAX reference mirroring the kernel's
    #    exact math (combined weights, bf16 A-matmuls, f32 accumulation).
    x_m, y_m = pdhg_net_reference(params, x, y, A, AT, c, b,
                                  mirror_kernel_precision=True)
    assert jnp.allclose(x_out, x_m, atol=5e-3, rtol=5e-3)
    assert jnp.allclose(y_out, y_m, atol=5e-3, rtol=5e-3)

    # 2) Faithful-to-PyTorch fp32 reference (separate 2*A@Wkx and A@Vkx terms);
    #    looser tolerance covers the bf16 MXU inputs + algebraic recombination.
    x_r, y_r = pdhg_net_reference(params, x, y, A, AT, c, b,
                                  mirror_kernel_precision=False)
    assert jnp.allclose(x_out, x_r, atol=5e-2, rtol=5e-2)
    assert jnp.allclose(y_out, y_r, atol=5e-2, rtol=5e-2)

    print("KERNEL_OK")
</pallas_src>

<mosaic_0001>
module attributes {stable_mosaic.version = 11 : i64} {
  func.func @_embed_kernel(%arg0: memref<64x8xf32, #tpu.memory_space<vmem>>, %arg1: memref<32x4xf32, #tpu.memory_space<vmem>>, %arg2: memref<8x128xf32, #tpu.memory_space<vmem>>, %arg3: memref<1x128xf32, #tpu.memory_space<vmem>>, %arg4: memref<4x128xf32, #tpu.memory_space<vmem>>, %arg5: memref<1x128xf32, #tpu.memory_space<vmem>>, %arg6: memref<64x128xf32, #tpu.memory_space<vmem>>, %arg7: memref<32x128xf32, #tpu.memory_space<vmem>>) attributes {dimension_semantics = [], scalar_prefetch = 0 : i64, scratch_operands = 0 : i64, tpu.core_type = #tpu.core_type<tc>} {
    %c0 = arith.constant 0 : index
    %c0_0 = arith.constant 0 : index
    %0 = vector.load %arg0[%c0, %c0_0] : memref<64x8xf32, #tpu.memory_space<vmem>>, vector<64x8xf32>
    %c0_1 = arith.constant 0 : index
    %c0_2 = arith.constant 0 : index
    %1 = vector.load %arg2[%c0_1, %c0_2] : memref<8x128xf32, #tpu.memory_space<vmem>>, vector<8x128xf32>
    %cst = arith.constant dense<0.000000e+00> : vector<64x128xf32>
    %2 = tpu.matmul %0, %1, %cst {dimension_numbers = #tpu.dot_dimension_numbers<[1], [0], [0], [1], [0, 0, 1, 1], [], []>} : vector<64x8xf32>, vector<8x128xf32>, vector<64x128xf32> -> vector<64x128xf32>
    %c0_3 = arith.constant 0 : index
    %c0_4 = arith.constant 0 : index
    %3 = vector.load %arg3[%c0_3, %c0_4] : memref<1x128xf32, #tpu.memory_space<vmem>>, vector<1x128xf32>
    %4 = vector.broadcast %3 : vector<1x128xf32> to vector<64x128xf32>
    %5 = arith.addf %2, %4 : vector<64x128xf32>
    %cst_5 = arith.constant 0.000000e+00 : f32
    %6 = vector.broadcast %cst_5 : f32 to vector<64x128xf32>
    %7 = arith.maximumf %5, %6 : vector<64x128xf32>
    %c0_6 = arith.constant 0 : index
    %c0_7 = arith.constant 0 : index
    %8 = vector.load %arg6[%c0_6, %c0_7] : memref<64x128xf32, #tpu.memory_space<vmem>>, vector<64x128xf32>
    tpu.vector_store %arg6[%c0_6, %c0_7], %7 {strides = array<i32>} : memref<64x128xf32, #tpu.memory_space<vmem>>, vector<64x128xf32>,
    %c0_8 = arith.constant 0 : index
    %c0_9 = arith.constant 0 : index
    %9 = vector.load %arg1[%c0_8, %c0_9] : memref<32x4xf32, #tpu.memory_space<vmem>>, vector<32x4xf32>
    %c0_10 = arith.constant 0 : index
    %c0_11 = arith.constant 0 : index
    %10 = vector.load %arg4[%c0_10, %c0_11] : memref<4x128xf32, #tpu.memory_space<vmem>>, vector<4x128xf32>
    %cst_12 = arith.constant dense<0.000000e+00> : vector<32x128xf32>
    %11 = tpu.matmul %9, %10, %cst_12 {dimension_numbers = #tpu.dot_dimension_numbers<[1], [0], [0], [1], [0, 0, 1, 1], [], []>} : vector<32x4xf32>, vector<4x128xf32>, vector<32x128xf32> -> vector<32x128xf32>
    %c0_13 = arith.constant 0 : index
    %c0_14 = arith.constant 0 : index
    %12 = vector.load %arg5[%c0_13, %c0_14] : memref<1x128xf32, #tpu.memory_space<vmem>>, vector<1x128xf32>
    %13 = vector.broadcast %12 : vector<1x128xf32> to vector<32x128xf32>
    %14 = arith.addf %11, %13 : vector<32x128xf32>
    %cst_15 = arith.constant 0.000000e+00 : f32
    %15 = vector.broadcast %cst_15 : f32 to vector<32x128xf32>
    %16 = arith.maximumf %14, %15 : vector<32x128xf32>
    %c0_16 = arith.constant 0 : index
    %c0_17 = arith.constant 0 : index
    %17 = vector.load %arg7[%c0_16, %c0_17] : memref<32x128xf32, #tpu.memory_space<vmem>>, vector<32x128xf32>
    tpu.vector_store %arg7[%c0_16, %c0_17], %16 {strides = array<i32>} : memref<32x128xf32, #tpu.memory_space<vmem>>, vector<32x128xf32>,
    return
  }
}

</mosaic_0001>

<bundles_post_ra>
// kernel: tpu_custom_call.1
= control target key start
LH: loop header
LB: loop body
LE: loop exit
PB: predicated region body
PF: predicated region fallthrough
CT: control target
= control target key end

     0   :  { %13 = vsyncpa [#allocation3], 0  ;;  %vm43_vm0 = vcmask 64512   ;;  %vm214_vm1 = vcmask 1043456   ;;  %vm201_vm2 = vcmask 31744   ;;  %s554_s0 = inlined_call_operand.vmem [shape: f32[64,8], index: 0, kind: input, shape index: {}]   ;;  %s555_s1 = inlined_call_operand.vmem [shape: f32[32,4], index: 1, kind: input, shape index: {}]   ;;  %s556_s2 = inlined_call_operand.vmem [shape: f32[8,128], index: 2, kind: input, shape index: {}]   ;;  %s557_s3 = inlined_call_operand.vmem [shape: f32[1,128], index: 3, kind: input, shape index: {}]   ;;  %s558_s4 = inlined_call_operand.vmem [shape: f32[4,128], index: 4, kind: input, shape index: {}]   ;;  %s559_s5 = inlined_call_operand.vmem [shape: f32[1,128], index: 5, kind: input, shape index: {}]   ;;  %s560_s6 = inlined_call_operand.hbm [shape: f32[64,128], index: 6, kind: output, shape index: {0}]   ;;  %s561_s7 = inlined_call_operand.hbm [shape: f32[32,128], index: 7, kind: output, shape index: {1}]  }
   0x1   :  { %v35_v0 = vld [vmem:[%s556_s2] sm:$0xff]  ;;  %v33_v2 = vld [vmem:[%s554_s0 + $0x30] sm:$0xff]  ;;  %v28_v3 = vld [vmem:[%s554_s0 + $0x8] sm:$0xff] }
   0x2   :  { %v27_v1 = vld [vmem:[%s554_s0] sm:$0xff]  ;;  %372 = vmatprep.subr.mxu0 %v35_v0  ;;  %394 = vmatprep.subr.mxu1 %v35_v0  ;;  %v34_v4 = vld [vmem:[%s554_s0 + $0x38] sm:$0xff]  ;;  %v29_v6 = vld [vmem:[%s554_s0 + $0x10] sm:$0xff] }
   0x3   :  { %373 = vmatpush3.msra.mxu0 %v35_v0  ;;  %395 = vmatpush3.msra.mxu1 %v35_v0  ;;  %v193_v5 = vld [vmem:[%s558_s4] sm:$0xf] }
   0x4   :  { %374 = vmatprep.mubr.msk.f32.mxu0 %vm43_vm0, %v27_v1  ;;  %383 = vmatprep.mubr.msk.f32.mxu1 %vm43_vm0, %v33_v2  ;;  %v189_v7 = vld [vmem:[%s555_s1] sm:$0xff] }
   0x5   :  { %375 = vmatmul.mubr.msk.f32.vlgmr.msra.gmra.mxu0 %vm43_vm0, %v28_v3  ;;  %384 = vmatmul.mubr.msk.f32.vlgmr.msra.gmra.mxu1 %vm43_vm0, %v34_v4 }
   0x6   :  { %14 = vsyncpa [#allocation5], 0  ;;  %386 = vmatprep.subr.msk.mxu1 %vm214_vm1, %v193_v5  ;;  %377 = vmatprep.mubr.msk.f32.mxu0 %vm43_vm0, %v29_v6  ;;  %v30_v8 = vld [vmem:[%s554_s0 + $0x18] sm:$0xff]  ;;  %v190_v9 = vld [vmem:[%s555_s1 + $0x8] sm:$0xff] }
   0x7   :  { %387 = vmatpush3.msk.msra.mxu1 %vm214_vm1, %v193_v5  ;;  %388 = vmatprep.mubr.msk.f32.mxu1 %vm201_vm2, %v189_v7  ;;  %v31_v10 = vld [vmem:[%s554_s0 + $0x20] sm:$0xff]  ;;  %v191_v11 = vld [vmem:[%s555_s1 + $0x10] sm:$0xff]  ;;  %v32_v12 = vld [vmem:[%s554_s0 + $0x28] sm:$0xff] }
   0x8   :  { %v192_v13 = vld [vmem:[%s555_s1 + $0x18] sm:$0xff]  ;;  %v343_v14 = vld [vmem:[%s557_s3] ss:$0 sm:$0xff]  ;;  %s444_s1 = smov [#allocation2]  }
   0x9   :  { %378 = vmatmul.mubr.msk.f32.gmra.mxu0 %vm43_vm0, %v30_v8  ;;  %389 = vmatmul.mubr.msk.f32.vlgmr.msra.gmra.mxu1 %vm201_vm2, %v190_v9  ;;  %v352_v21 = vld [vmem:[%s559_s5] ss:$0 sm:$0xff]  ;;  %s316_s3 = sshll.u32 %s444_s1, 4  ;;  %s445_s5 = smov [#allocation4]   ;;  %s317_s3 = int_to_ptr.vmem [resolvable:$true] %s316_s3 }
   0xa   :  { %380 = vmatprep.mubr.msk.f32.mxu0 %vm43_vm0, %v31_v10  ;;  %391 = vmatprep.mubr.msk.f32.mxu1 %vm201_vm2, %v191_v11  ;;  %s328_s30 = sshll.u32 %s445_s5, 4  ;;  %s400_s8 = scalar_lea.vmem %s317_s3, 1024  ;;  %s329_s30 = int_to_ptr.vmem [resolvable:$true] %s328_s30 }
   0xb   :  { %p401_p0 = scmp.ne.s32.totalorder %s317_s3, %s400_s8  ;;  %p405_p1 = scmp.lt.s32.totalorder %s317_s3, %s317_s3 }
   0xc   :  { %p406_p2 = scmp.lt.s32.totalorder %s400_s8, %s400_s8 }
   0xd   :  { %381 = vmatmul.mubr.msk.f32.gmra.mxu0 %vm43_vm0, %v32_v12  ;;  %392 = vmatmul.mubr.msk.f32.gmra.mxu1 %vm201_vm2, %v192_v13 }
   0xe   :  { %p407_p3 = por %p406_p2, %p405_p1 }
  0x10   :  { %p408_p4 = pnand %p407_p3, %p401_p0 }
  0xc5   :  { %v376_v15 = vpop.f32.mrf.mxu0  ;;  %v385_v16 = vpop.f32.mrf.mxu1 }
  0xc6   :  { %v140_v17 = vadd.f32 %v376_v15, %v343_v14  ;;  %v170_v18 = vadd.f32 %v385_v16, %v343_v14 }
  0xc7   :  { %v134_v19 = vpop.f32.mrf.mxu0  ;;  %v164_v20 = vpop.f32.mrf.mxu1 }
  0xc8   :  { %v174_v22 = vmax.f32 %v140_v17, 0.0  ;;  %v180_v23 = vmax.f32 %v170_v18, 0.0  ;;  %v135_v24 = vadd.f32 %v343_v14, %v134_v19  ;;  %v165_v25 = vadd.f32 %v343_v14, %v164_v20 }
  0xc9   :  { %v379_v26 = vpop.f32.mrf.mxu0  ;;  %v390_v27 = vpop.f32.mrf.mxu1 }
  0xca   :  { %182 = vst [vmem:[#allocation2 + $0x8] sm:$0xff] %v174_v22  ;;  %188 = vst [vmem:[#allocation2 + $0x38] sm:$0xff] %v180_v23  ;;  %v173_v28 = vmax.f32 %v135_v24, 0.0  ;;  %v179_v29 = vmax.f32 %v165_v25, 0.0  ;;  %v150_v30 = vadd.f32 %v379_v26, %v343_v14  ;;  %v290_v31 = vadd.f32 %v390_v27, %v352_v21 }
  0xcb   :  { %v144_v32 = vpop.f32.mrf.mxu0  ;;  %v284_v33 = vpop.f32.mrf.mxu1 }
  0xcc   :  { %181 = vst [vmem:[#allocation2] sm:$0xff] %v173_v28  ;;  %187 = vst [vmem:[#allocation2 + $0x30] sm:$0xff] %v179_v29  ;;  %v176_v34 = vmax.f32 %v150_v30, 0.0  ;;  %v304_v35 = vmax.f32 %v290_v31, 0.0  ;;  %v145_v36 = vadd.f32 %v343_v14, %v144_v32  ;;  %v285_v37 = vadd.f32 %v352_v21, %v284_v33 }
  0xcd   :  { %v382_v38 = vpop.f32.mrf.mxu0  ;;  %v393_v39 = vpop.f32.mrf.mxu1 }
  0xce   :  { %184 = vst [vmem:[#allocation2 + $0x18] sm:$0xff] %v176_v34  ;;  %308 = vst [vmem:[#allocation4 + $0x8] sm:$0xff] %v304_v35  ;;  %v175_v40 = vmax.f32 %v145_v36, 0.0  ;;  %v303_v41 = vmax.f32 %v285_v37, 0.0  ;;  %v160_v42 = vadd.f32 %v382_v38, %v343_v14  ;;  %v300_v43 = vadd.f32 %v393_v39, %v352_v21 }
  0xcf   :  { %v154_v44 = vpop.f32.mrf.mxu0  ;;  %v294_v45 = vpop.f32.mrf.mxu1 }
  0xd0   :  { %183 = vst [vmem:[#allocation2 + $0x10] sm:$0xff] %v175_v40  ;;  %307 = vst [vmem:[#allocation4] sm:$0xff] %v303_v41  ;;  %v178_v46 = vmax.f32 %v160_v42, 0.0  ;;  %v306_v47 = vmax.f32 %v300_v43, 0.0  ;;  %v155_v48 = vadd.f32 %v343_v14, %v154_v44  ;;  %v295_v49 = vadd.f32 %v352_v21, %v294_v45 }
  0xd2   :  { %186 = vst [vmem:[#allocation2 + $0x28] sm:$0xff] %v178_v46  ;;  %310 = vst [vmem:[#allocation4 + $0x18] sm:$0xff] %v306_v47  ;;  %v177_v50 = vmax.f32 %v155_v48, 0.0  ;;  %v305_v51 = vmax.f32 %v295_v49, 0.0 }
  0xd4   :  { %185 = vst [vmem:[#allocation2 + $0x20] sm:$0xff] %v177_v50  ;;  %309 = vst [vmem:[#allocation4 + $0x10] sm:$0xff] %v305_v51 }
  0xd5   :  { %411 = shalt.err (!%p408_p4)
}
  0xd6   :  { %s446_s9 = smov 128   ;;  %s447_s10 = smov 8  }
  0xd7   :  { %322 = dma.vmem_to_hbm [thread:$0]  %s317_s3, 1024, %s560_s6, [#allocation3], %s446_s9, %s446_s9, %s447_s10  }
  0xd8   :  { %s420_s12 = scalar_lea.vmem %s329_s30, 512  ;;  %p425_p6 = scmp.lt.s32.totalorder %s329_s30, %s329_s30 }
  0xd9   :  { %p421_p5 = scmp.ne.s32.totalorder %s329_s30, %s420_s12  ;;  %p426_p7 = scmp.lt.s32.totalorder %s420_s12, %s420_s12 }
  0xdb   :  { %p427_p8 = por %p426_p7, %p425_p6 }
  0xdd   :  { %p428_p9 = pnand %p427_p8, %p421_p5 }
  0xdf   :  { %431 = shalt.err (!%p428_p9)
}
  0xe0   :  { %334 = dma.vmem_to_hbm [thread:$0]  %s329_s30, 512, %s561_s7, [#allocation5], %s446_s9, %s446_s9, %s447_s10  }
  0xe1   :  { %440 = dma.done.wait [#allocation3], 1024  }
  0xe2   :  { %441 = vsyncadd [#allocation3], 4294966272 }
  0xe3   :  { %442 = dma.done.wait [#allocation5], 512  }
  0xe4   :  { %443 = vsyncadd [#allocation5], 4294966784 }
  0xe5   :  { %341 = vsyncpa [#allocation3], 1 }
  0xe6   :  { %342 = vsyncpa [#allocation5], 1 }

</bundles_post_ra>
